<compile_context>
chip_gen: v7x
topology: tpu7x:2x2x1
jax: 0.10.0
libtpu: 0.0.40
codegen_flags: <defaults>
</compile_context>

<pallas_src>
import functools

import jax
import jax.numpy as jnp
from jax.experimental import pallas as pl
from jax.experimental.pallas import tpu as pltpu


def _round_up(x, m):
    return ((x + m - 1) // m) * m


# ----------------------------------------------------------------------------
# Kernel: one grid step = (batch tile, timestep).  Grid = (B//tb, T).
# ----------------------------------------------------------------------------
def lstmwebnet_kernel(
    i_ref,        # (1, tb, n_in)       input nodes at timestep t
    act0_ref,     # (tb, Npad)          initial [h | o | 0] activations
    cells0_ref,   # (tb, Cp, Npad)      initial cell state  [ch | co | 0]
    wi_ref,       # (n_in, Npad)  bf16  fused [w_ih_T | w_io_T]          (resident)
    wh_ref,       # (Npad, Npad)  bf16  fused [w_hh_T | w_ho_T], rows>=H zero (resident)
    b_ref,        # (1, Npad)     f32   fused pre-summed bias            (resident)
    lstm_ref,     # (13*Cp, Npad) f32   per-node-lane LSTM slab, pre-scaled (resident)
    actseq_ref,   # out (1, tb, Npad)   activations at timestep t
    cells_ref,    # out (tb, Cp, Npad)  cell state (grid-resident accumulator)
    act_state,    # scratch VMEM (tb, Npad)  activation state across timesteps
    *, c_pad,
):
    t = pl.program_id(1)
    Cp = c_pad

    # Initialize the resident state at the first timestep of this batch tile.
    @pl.when(t == 0)
    def _():
        act_state[...] = act0_ref[...]
        cells_ref[...] = cells0_ref[...]

    hprev = act_state[...]                      # (tb, Npad)     f32
    cprev = cells_ref[...]                      # (tb, Cp, Npad) f32

    # ---- fused i_to_h / h_to_h / i_to_o / h_to_o : two bf16 MXU matmuls ----
    xin = (jnp.dot(i_ref[0].astype(jnp.bfloat16), wi_ref[...],
                   preferred_element_type=jnp.float32)
           + jnp.dot(hprev.astype(jnp.bfloat16), wh_ref[...],
                     preferred_element_type=jnp.float32)
           + b_ref[...])
    xin = jnp.maximum(xin, 0.0)                 # in_activation = ReLU, (tb, Npad)

    wih = lstm_ref[0 * Cp:4 * Cp, :]            # (4Cp, Npad)  pre-scaled
    whh = lstm_ref[4 * Cp:8 * Cp, :]            # (4Cp, Npad)  pre-scaled
    bg = lstm_ref[8 * Cp:12 * Cp, :]            # (4Cp, Npad)  pre-scaled
    whr = lstm_ref[12 * Cp:13 * Cp, :]          # (Cp, Npad)   projection

    # ---- all gate pre-activations in one broadcasted FMA slab ----
    pre = (xin[:, None, :] * wih[None, :, :]
           + hprev[:, None, :] * whh[None, :, :]
           + bg[None, :, :])                    # (tb, 4Cp, Npad)

    # Single tanh over the slab; sigmoid gates recovered as 0.5*tanh(z/2)+0.5
    # (the 0.5 / 1.0 per-gate scales are baked into the slab at pack time).
    tg = jnp.tanh(pre)
    ig = 0.5 * tg[:, 0 * Cp:1 * Cp, :] + 0.5    # input gate
    fg = 0.5 * tg[:, 1 * Cp:2 * Cp, :] + 0.5    # forget gate
    gg = tg[:, 2 * Cp:3 * Cp, :]                # cell gate (true tanh)
    og = 0.5 * tg[:, 3 * Cp:4 * Cp, :] + 0.5    # output gate

    c_new = fg * cprev + ig * gg                # (tb, Cp, Npad)
    # projection h_t = W_hr @ h_full (reduce over the Cp sublane axis)
    h_out = jnp.sum(og * jnp.tanh(c_new) * whr[None, :, :], axis=1)   # (tb, Npad)
    act_new = jnp.maximum(h_out, 0.0)           # lstm_activation = ReLU

    act_state[...] = act_new
    cells_ref[...] = c_new
    actseq_ref[0] = act_new


# ----------------------------------------------------------------------------
# One-time parameter packing
# ----------------------------------------------------------------------------
def pack_params(p, n_in, n_hid, n_out, cell):
    n_nodes = n_hid + n_out
    n_pad = _round_up(n_nodes, 128)
    c_pad = _round_up(cell, 8)

    # Fused input->node linear: [w_ih_T | w_io_T], zero-padded node lanes, bf16.
    w_i = jnp.concatenate([p["w_ih_T"], p["w_io_T"]], axis=1)
    w_i = jnp.pad(w_i, ((0, 0), (0, n_pad - n_nodes))).astype(jnp.bfloat16)

    # Fused node->node linear on the padded node axis: rows [0:H) hold
    # [w_hh_T | w_ho_T], all other rows zero, so `act @ w_h` reads only the
    # hidden lanes of the packed activation slab (no per-step lane slicing).
    w_h = jnp.concatenate([p["w_hh_T"], p["w_ho_T"]], axis=1)
    w_h = jnp.pad(w_h, ((0, n_pad - n_hid), (0, n_pad - n_nodes))).astype(jnp.bfloat16)

    # Pre-summed bias: [b_ih + b_hh | b_io + b_ho | 0-pad]  (f32).
    b = jnp.concatenate([p["b_ih"] + p["b_hh"], p["b_io"] + p["b_ho"]], axis=1)
    b = jnp.pad(b, ((0, 0), (0, n_pad - n_nodes)))

    # Per-node-lane LSTM slab: hidden-LSTM weights on lanes [0,H), output-LSTM
    # weights on lanes [H,H+O); zeros on padded lanes and padded cell rows
    # (ZERO INVARIANT — see header).  Sigmoid-gate rows (i, f, o) are pre-scaled
    # by 0.5 so the kernel can use a single tanh: sigmoid(z) = 0.5*tanh(z/2)+0.5.
    gate_scale = jnp.array([0.5, 0.5, 1.0, 0.5], jnp.float32)
    one = jnp.ones((1,), jnp.float32)

    def per_node(h_arr, o_arr, scale):
        # h_arr/o_arr: (G, cell) with G in {4, 1}; gate-major, cell-minor rows.
        def expand(a, n_rep):
            a = a * scale[:, None]
            a = jnp.pad(a, ((0, 0), (0, c_pad - cell)))       # (G, Cp)
            return jnp.tile(a.reshape(-1, 1), (1, n_rep))     # (G*Cp, n_rep)
        cols = jnp.concatenate([expand(h_arr, n_hid), expand(o_arr, n_out)], axis=1)
        return jnp.pad(cols, ((0, 0), (0, n_pad - n_nodes)))

    lstm = jnp.concatenate([
        per_node(p["hl_wih"], p["ol_wih"], gate_scale),   # rows [0, 4Cp)
        per_node(p["hl_whh"], p["ol_whh"], gate_scale),   # rows [4Cp, 8Cp)
        per_node(p["hl_b"],   p["ol_b"],   gate_scale),   # rows [8Cp, 12Cp)
        per_node(p["hl_whr"], p["ol_whr"], one),          # rows [12Cp, 13Cp)
    ], axis=0)                                            # (13*Cp, Npad)

    return {"w_i": w_i, "w_h": w_h, "b": b, "lstm": lstm}


# ----------------------------------------------------------------------------
# Packed-state helpers (call once per sequence, NOT per step)
# ----------------------------------------------------------------------------
def pack_state(h, o, h_cells, o_cells, packed):
    n_pad = packed["lstm"].shape[1]
    c_pad = packed["lstm"].shape[0] // 13
    cell = h_cells.shape[1]
    n_nodes = h.shape[1] + o.shape[1]
    act = jnp.pad(jnp.concatenate([h, o], axis=1), ((0, 0), (0, n_pad - n_nodes)))
    cells = jnp.concatenate([h_cells, o_cells], axis=2)                # (B, C, H+O)
    cells = jnp.pad(cells, ((0, 0), (0, c_pad - cell), (0, n_pad - n_nodes)))
    return act, cells                                                  # (B,Npad),(B,Cp,Npad)


def unpack_state(act, cells, n_hid, n_out, cell):
    h = act[:, :n_hid]
    o = act[:, n_hid:n_hid + n_out]
    ch = cells[:, :cell, :n_hid]
    co = cells[:, :cell, n_hid:n_hid + n_out]
    return h, o, ch, co


# ----------------------------------------------------------------------------
# Sequence forward: T timesteps inside ONE pallas_call
# ----------------------------------------------------------------------------
@functools.partial(jax.jit, static_argnames=("batch_tile",))
def lstmwebnet_forward_seq(i_seq, act, cells, packed, *, batch_tile=None):
    """i_seq: (T, B, n_in); act: (B, Npad); cells: (B, Cp, Npad) (packed layout).
    Returns (act_seq (T, B, Npad), cells_out (B, Cp, Npad))."""
    T, B, n_in = i_seq.shape
    n_pad = act.shape[1]
    c_pad = cells.shape[1]
    tb = B if batch_tile is None else batch_tile
    assert B % tb == 0 and (tb == B or tb % 8 == 0), \
        "batch_tile must divide B and be a multiple of 8 (or equal B)"
    # TODO(synk): on v7x size tb against 64 MiB VMEM / 2 TCs and set
    #             vmem_limit_bytes explicitly for large models.

    grid = (B // tb, T)
    kernel = functools.partial(lstmwebnet_kernel, c_pad=c_pad)

    act_seq, cells_out = pl.pallas_call(
        kernel,
        out_shape=(
            jax.ShapeDtypeStruct((T, B, n_pad), jnp.float32),
            jax.ShapeDtypeStruct((B, c_pad, n_pad), jnp.float32),
        ),
        grid_spec=pltpu.PrefetchScalarGridSpec(
            num_scalar_prefetch=0,
            grid=grid,
            in_specs=[
                pl.BlockSpec((1, tb, n_in), lambda bi, t: (t, bi, 0)),      # i_t
                pl.BlockSpec((tb, n_pad), lambda bi, t: (bi, 0)),           # act init
                pl.BlockSpec((tb, c_pad, n_pad), lambda bi, t: (bi, 0, 0)), # cells init
                pl.BlockSpec((n_in, n_pad), lambda bi, t: (0, 0)),          # w_i (resident)
                pl.BlockSpec((n_pad, n_pad), lambda bi, t: (0, 0)),         # w_h (resident)
                pl.BlockSpec((1, n_pad), lambda bi, t: (0, 0)),             # b   (resident)
                pl.BlockSpec((13 * c_pad, n_pad), lambda bi, t: (0, 0)),    # lstm slab
            ],
            out_specs=(
                pl.BlockSpec((1, tb, n_pad), lambda bi, t: (t, bi, 0)),     # act per step
                pl.BlockSpec((tb, c_pad, n_pad), lambda bi, t: (bi, 0, 0)), # cells (resident)
            ),
            scratch_shapes=[pltpu.VMEM((tb, n_pad), jnp.float32)],          # act state
        ),
        compiler_params=pltpu.CompilerParams(
            dimension_semantics=("parallel", "arbitrary")),
    )(i_seq, act, cells, packed["w_i"], packed["w_h"], packed["b"], packed["lstm"])
    return act_seq, cells_out


# ----------------------------------------------------------------------------
# Single-step, module-equivalent API (compat wrapper around the seq kernel)
# ----------------------------------------------------------------------------
def lstmwebnet_forward(i, h, o, h_cells, o_cells, packed):
    """Module-equivalent single step.  For repeated stepping use pack_state +
    lstmwebnet_forward_seq to keep the state in the packed layout."""
    n_hid, n_out, cell = h.shape[1], o.shape[1], h_cells.shape[1]
    act, cells = pack_state(h, o, h_cells, o_cells, packed)
    act_seq, cells_out = lstmwebnet_forward_seq(i[None], act, cells, packed)
    return unpack_state(act_seq[0], cells_out, n_hid, n_out, cell)


# ----------------------------------------------------------------------------
# Pure-JAX reference (mirrors the PyTorch module math, f32, no fusion)
# ----------------------------------------------------------------------------
def lstmwebnet_reference(i, h, o, h_cells, o_cells, p):
    inh = jnp.maximum(i @ p["w_ih_T"] + p["b_ih"] + h @ p["w_hh_T"] + p["b_hh"], 0.0)
    ino = jnp.maximum(i @ p["w_io_T"] + p["b_io"] + h @ p["w_ho_T"] + p["b_ho"], 0.0)

    def step(xin, hprev, cprev, wih, whh, b, whr):
        x3 = xin[:, None, :]
        h3 = hprev[:, None, :]
        pre = lambda g: (x3 * wih[g][None, :, None] + h3 * whh[g][None, :, None]
                         + b[g][None, :, None])
        ig, fg = jax.nn.sigmoid(pre(0)), jax.nn.sigmoid(pre(1))
        gg, og = jnp.tanh(pre(2)), jax.nn.sigmoid(pre(3))
        c_new = fg * cprev + ig * gg
        h_out = jnp.sum(og * jnp.tanh(c_new) * whr[0][None, :, None], axis=1)
        return h_out, c_new

    h_out, ch = step(inh, h, h_cells, p["hl_wih"], p["hl_whh"], p["hl_b"], p["hl_whr"])
    o_out, co = step(ino, o, o_cells, p["ol_wih"], p["ol_whh"], p["ol_b"], p["ol_whr"])
    return jnp.maximum(h_out, 0.0), jnp.maximum(o_out, 0.0), ch, co


# ----------------------------------------------------------------------------
# Deterministic parameter construction (PyTorch-style uniform init)
# ----------------------------------------------------------------------------
def make_params(key, n_in, n_hid, n_out, cell):
    ks = list(jax.random.split(key, 16))
    u = lambda k, shape, bound: jax.random.uniform(k, shape, jnp.float32, -bound, bound)

    kin = 1.0 / jnp.sqrt(float(n_in))
    khid = 1.0 / jnp.sqrt(float(n_hid))
    kc = 1.0 / jnp.sqrt(float(cell))

    def lstm_params(k1, k2, k3, k4, k5):
        w_ih = u(k1, (4 * cell, 1), kc).reshape(4, cell)        # input weights
        w_hh = u(k2, (4 * cell, 1), kc).reshape(4, cell)        # recurrent (proj=1)
        b = (u(k3, (4 * cell,), kc) + u(k4, (4 * cell,), kc)).reshape(4, cell)
        w_hr = u(k5, (1, cell), kc)                             # projection
        return w_ih, w_hh, b, w_hr

    hl = lstm_params(*ks[8:13])
    ol = lstm_params(*jax.random.split(ks[13], 5))

    return {
        # nn.Linear weights stored transposed: (in_features, out_features)
        "w_ih_T": u(ks[0], (n_in, n_hid), kin),
        "b_ih":   u(ks[1], (1, n_hid), kin),
        "w_hh_T": u(ks[2], (n_hid, n_hid), khid),
        "b_hh":   u(ks[3], (1, n_hid), khid),
        "w_io_T": u(ks[4], (n_in, n_out), kin),
        "b_io":   u(ks[5], (1, n_out), kin),
        "w_ho_T": u(ks[6], (n_hid, n_out), khid),
        "b_ho":   u(ks[7], (1, n_out), khid),
        "hl_wih": hl[0], "hl_whh": hl[1], "hl_b": hl[2], "hl_whr": hl[3],
        "ol_wih": ol[0], "ol_whh": ol[1], "ol_b": ol[2], "ol_whr": ol[3],
    }


if __name__ == "__main__":
    B, N_IN, N_HID, N_OUT, C = 4, 8, 16, 8, 4

    key = jax.random.PRNGKey(0)
    kp, ki, kh, ko, kch, kco, kis, kb = jax.random.split(key, 8)

    params = make_params(kp, N_IN, N_HID, N_OUT, C)
    packed = pack_params(params, N_IN, N_HID, N_OUT, C)

    i = jax.random.normal(ki, (B, N_IN), jnp.float32)
    h = jax.random.normal(kh, (B, N_HID), jnp.float32)
    o = jax.random.normal(ko, (B, N_OUT), jnp.float32)
    h_cells = jax.random.normal(kch, (B, C, N_HID), jnp.float32)   # usually zeros; random for test
    o_cells = jax.random.normal(kco, (B, C, N_OUT), jnp.float32)

    # --- Test 1: single-step, module-equivalent API -------------------------
    new_h, new_o, new_ch, new_co = lstmwebnet_forward(i, h, o, h_cells, o_cells, packed)
    jax.block_until_ready((new_h, new_o, new_ch, new_co))
    r_h, r_o, r_ch, r_co = lstmwebnet_reference(i, h, o, h_cells, o_cells, params)
    for a, b_ in ((new_h, r_h), (new_o, r_o), (new_ch, r_ch), (new_co, r_co)):
        assert a.shape == b_.shape, "shape mismatch vs reference"
        # bf16 matmul inputs -> loosened tolerance
        assert jnp.allclose(a, b_, rtol=2e-2, atol=2e-2), "single-step mismatch"

    # --- Test 2: T timesteps with the time loop inside the kernel -----------
    T = 6
    i_seq = jax.random.normal(kis, (T, B, N_IN), jnp.float32)
    act0, cells0 = pack_state(h, o, h_cells, o_cells, packed)
    act_seq, cells_out = lstmwebnet_forward_seq(i_seq, act0, cells0, packed)
    jax.block_until_ready((act_seq, cells_out))
    rh, ro, rch, rco = h, o, h_cells, o_cells
    for t in range(T):
        rh, ro, rch, rco = lstmwebnet_reference(i_seq[t], rh, ro, rch, rco, params)
    kh_, ko_, kch_, kco_ = unpack_state(act_seq[T - 1], cells_out, N_HID, N_OUT, C)
    for a, b_ in ((kh_, rh), (ko_, ro), (kch_, rch), (kco_, rco)):
        assert a.shape == b_.shape, "shape mismatch vs reference (seq)"
        assert jnp.allclose(a, b_, rtol=5e-2, atol=5e-2), "seq mismatch"

    # --- Test 3: parallel batch grid (2 batch tiles x T timesteps) ----------
    B2, T2, TB = 16, 3, 8
    k2 = jax.random.split(kb, 5)
    i_seq2 = jax.random.normal(k2[0], (T2, B2, N_IN), jnp.float32)
    h2 = jax.random.normal(k2[1], (B2, N_HID), jnp.float32)
    o2 = jax.random.normal(k2[2], (B2, N_OUT), jnp.float32)
    ch2 = jax.random.normal(k2[3], (B2, C, N_HID), jnp.float32)
    co2 = jax.random.normal(k2[4], (B2, C, N_OUT), jnp.float32)
    act0b, cells0b = pack_state(h2, o2, ch2, co2, packed)
    act_seq2, cells_out2 = lstmwebnet_forward_seq(i_seq2, act0b, cells0b, packed,
                                                  batch_tile=TB)
    jax.block_until_ready((act_seq2, cells_out2))
    rh, ro, rch, rco = h2, o2, ch2, co2
    for t in range(T2):
        rh, ro, rch, rco = lstmwebnet_reference(i_seq2[t], rh, ro, rch, rco, params)
    kh2, ko2, kch2, kco2 = unpack_state(act_seq2[T2 - 1], cells_out2, N_HID, N_OUT, C)
    for a, b_ in ((kh2, rh), (ko2, ro), (kch2, rch), (kco2, rco)):
        assert a.shape == b_.shape, "shape mismatch vs reference (batched grid)"
        assert jnp.allclose(a, b_, rtol=5e-2, atol=5e-2), "batched-grid mismatch"

    print("KERNEL_OK")
</pallas_src>

<mosaic_0001>
module attributes {stable_mosaic.version = 11 : i64} {
  func.func @lstmwebnet_kernel(%arg0: i32, %arg1: i32, %arg2: memref<1x4x8xf32, #tpu.memory_space<vmem>>, %arg3: memref<4x128xf32, #tpu.memory_space<vmem>>, %arg4: memref<4x8x128xf32, #tpu.memory_space<vmem>>, %arg5: memref<8x128xbf16, #tpu.memory_space<vmem>>, %arg6: memref<128x128xbf16, #tpu.memory_space<vmem>>, %arg7: memref<1x128xf32, #tpu.memory_space<vmem>>, %arg8: memref<104x128xf32, #tpu.memory_space<vmem>>, %arg9: memref<1x4x128xf32, #tpu.memory_space<vmem>>, %arg10: memref<4x8x128xf32, #tpu.memory_space<vmem>>, %arg11: memref<4x128xf32, #tpu.memory_space<vmem>>) attributes {dimension_semantics = [#tpu.dimension_semantics<parallel>, #tpu.dimension_semantics<arbitrary>], iteration_bounds = array<i64: 1, 1>, scalar_prefetch = 0 : i64, scratch_operands = 1 : i64, tpu.core_type = #tpu.core_type<tc>, window_params = [{transform_indices = @transform_0, window_bounds = array<i64: 1, 4, 8>}, {transform_indices = @transform_1, window_bounds = array<i64: 4, 128>}, {transform_indices = @transform_2, window_bounds = array<i64: 4, 8, 128>}, {pipeline_mode = #tpu.pipeline_mode<synchronous>, transform_indices = @transform_3, window_bounds = array<i64: 8, 128>}, {pipeline_mode = #tpu.pipeline_mode<synchronous>, transform_indices = @transform_4, window_bounds = array<i64: 128, 128>}, {pipeline_mode = #tpu.pipeline_mode<synchronous>, transform_indices = @transform_5, window_bounds = array<i64: 1, 128>}, {pipeline_mode = #tpu.pipeline_mode<synchronous>, transform_indices = @transform_6, window_bounds = array<i64: 104, 128>}, {transform_indices = @transform_7, window_bounds = array<i64: 1, 4, 128>}, {transform_indices = @transform_8, window_bounds = array<i64: 4, 8, 128>}]} {
    %c0_i32 = arith.constant 0 : i32
    %0 = arith.cmpi eq, %arg1, %c0_i32 : i32
    %1 = arith.extui %0 : i1 to i32
    %c0_i32_0 = arith.constant 0 : i32
    %2 = arith.cmpi ne, %1, %c0_i32_0 : i32
    scf.if %2 {
      %c0_37 = arith.constant 0 : index
      %c0_38 = arith.constant 0 : index
      %70 = vector.load %arg3[%c0_37, %c0_38] : memref<4x128xf32, #tpu.memory_space<vmem>>, vector<4x128xf32>
      %c0_39 = arith.constant 0 : index
      %c0_40 = arith.constant 0 : index
      %71 = vector.load %arg11[%c0_39, %c0_40] : memref<4x128xf32, #tpu.memory_space<vmem>>, vector<4x128xf32>
      tpu.vector_store %arg11[%c0_39, %c0_40], %70 {strides = array<i32>} : memref<4x128xf32, #tpu.memory_space<vmem>>, vector<4x128xf32>,
      %c0_41 = arith.constant 0 : index
      %c0_42 = arith.constant 0 : index
      %c0_43 = arith.constant 0 : index
      %72 = vector.load %arg4[%c0_41, %c0_42, %c0_43] : memref<4x8x128xf32, #tpu.memory_space<vmem>>, vector<4x8x128xf32>
      %c0_44 = arith.constant 0 : index
      %c0_45 = arith.constant 0 : index
      %c0_46 = arith.constant 0 : index
      %73 = vector.load %arg10[%c0_44, %c0_45, %c0_46] : memref<4x8x128xf32, #tpu.memory_space<vmem>>, vector<4x8x128xf32>
      tpu.vector_store %arg10[%c0_44, %c0_45, %c0_46], %72 {strides = array<i32>} : memref<4x8x128xf32, #tpu.memory_space<vmem>>, vector<4x8x128xf32>,
    } else {
    }
    %c0 = arith.constant 0 : index
    %c0_1 = arith.constant 0 : index
    %3 = vector.load %arg11[%c0, %c0_1] : memref<4x128xf32, #tpu.memory_space<vmem>>, vector<4x128xf32>
    %c0_2 = arith.constant 0 : index
    %c0_3 = arith.constant 0 : index
    %c0_4 = arith.constant 0 : index
    %4 = vector.load %arg10[%c0_2, %c0_3, %c0_4] : memref<4x8x128xf32, #tpu.memory_space<vmem>>, vector<4x8x128xf32>
    %c0_5 = arith.constant 0 : index
    %c0_6 = arith.constant 0 : index
    %c0_7 = arith.constant 0 : index
    %5 = vector.load %arg2[%c0_5, %c0_6, %c0_7] : memref<1x4x8xf32, #tpu.memory_space<vmem>>, vector<1x4x8xf32>
    %6 = vector.shape_cast %5 : vector<1x4x8xf32> to vector<4x8xf32>
    %7 = arith.truncf %6 : vector<4x8xf32> to vector<4x8xbf16>
    %c0_8 = arith.constant 0 : index
    %c0_9 = arith.constant 0 : index
    %8 = vector.load %arg5[%c0_8, %c0_9] : memref<8x128xbf16, #tpu.memory_space<vmem>>, vector<8x128xbf16>
    %cst = arith.constant dense<0.000000e+00> : vector<4x128xf32>
    %9 = tpu.matmul %7, %8, %cst {dimension_numbers = #tpu.dot_dimension_numbers<[1], [0], [0], [1], [0, 0, 1, 1], [], []>} : vector<4x8xbf16>, vector<8x128xbf16>, vector<4x128xf32> -> vector<4x128xf32>
    %10 = arith.truncf %3 : vector<4x128xf32> to vector<4x128xbf16>
    %c0_10 = arith.constant 0 : index
    %c0_11 = arith.constant 0 : index
    %11 = vector.load %arg6[%c0_10, %c0_11] : memref<128x128xbf16, #tpu.memory_space<vmem>>, vector<128x128xbf16>
    %cst_12 = arith.constant dense<0.000000e+00> : vector<4x128xf32>
    %12 = tpu.matmul %10, %11, %cst_12 {dimension_numbers = #tpu.dot_dimension_numbers<[1], [0], [0], [1], [0, 0, 1, 1], [], []>} : vector<4x128xbf16>, vector<128x128xbf16>, vector<4x128xf32> -> vector<4x128xf32>
    %13 = arith.addf %9, %12 : vector<4x128xf32>
    %c0_13 = arith.constant 0 : index
    %c0_14 = arith.constant 0 : index
    %14 = vector.load %arg7[%c0_13, %c0_14] : memref<1x128xf32, #tpu.memory_space<vmem>>, vector<1x128xf32>
    %15 = vector.broadcast %14 : vector<1x128xf32> to vector<4x128xf32>
    %16 = arith.addf %13, %15 : vector<4x128xf32>
    %cst_15 = arith.constant 0.000000e+00 : f32
    %17 = vector.broadcast %cst_15 : f32 to vector<4x128xf32>
    %18 = arith.maximumf %16, %17 : vector<4x128xf32>
    %c0_16 = arith.constant 0 : index
    %c0_17 = arith.constant 0 : index
    %19 = vector.load %arg8[%c0_16, %c0_17] : memref<104x128xf32, #tpu.memory_space<vmem>>, vector<32x128xf32>
    %c32 = arith.constant 32 : index
    %c0_18 = arith.constant 0 : index
    %20 = vector.load %arg8[%c32, %c0_18] : memref<104x128xf32, #tpu.memory_space<vmem>>, vector<32x128xf32>
    %c64 = arith.constant 64 : index
    %c0_19 = arith.constant 0 : index
    %21 = vector.load %arg8[%c64, %c0_19] : memref<104x128xf32, #tpu.memory_space<vmem>>, vector<32x128xf32>
    %c96 = arith.constant 96 : index
    %c0_20 = arith.constant 0 : index
    %22 = vector.load %arg8[%c96, %c0_20] : memref<104x128xf32, #tpu.memory_space<vmem>>, vector<8x128xf32>
    %23 = vector.shape_cast %18 : vector<4x128xf32> to vector<4x1x128xf32>
    %24 = vector.shape_cast %19 : vector<32x128xf32> to vector<1x32x128xf32>
    %25 = vector.broadcast %23 : vector<4x1x128xf32> to vector<4x32x128xf32>
    %26 = vector.broadcast %24 : vector<1x32x128xf32> to vector<4x32x128xf32>
    %27 = arith.mulf %25, %26 : vector<4x32x128xf32>
    %28 = vector.shape_cast %3 : vector<4x128xf32> to vector<4x1x128xf32>
    %29 = vector.shape_cast %20 : vector<32x128xf32> to vector<1x32x128xf32>
    %30 = vector.broadcast %28 : vector<4x1x128xf32> to vector<4x32x128xf32>
    %31 = vector.broadcast %29 : vector<1x32x128xf32> to vector<4x32x128xf32>
    %32 = arith.mulf %30, %31 : vector<4x32x128xf32>
    %33 = arith.addf %27, %32 : vector<4x32x128xf32>
    %34 = vector.shape_cast %21 : vector<32x128xf32> to vector<1x32x128xf32>
    %35 = vector.broadcast %34 : vector<1x32x128xf32> to vector<4x32x128xf32>
    %36 = arith.addf %33, %35 : vector<4x32x128xf32>
    %37 = math.tanh %36 : vector<4x32x128xf32>
    %38 = vector.extract_strided_slice %37 {offsets = [0, 0, 0], sizes = [4, 8, 128], strides = [1, 1, 1]} : vector<4x32x128xf32> to vector<4x8x128xf32>
    %cst_21 = arith.constant 5.000000e-01 : f32
    %39 = vector.broadcast %cst_21 : f32 to vector<4x8x128xf32>
    %40 = arith.mulf %39, %38 : vector<4x8x128xf32>
    %cst_22 = arith.constant 5.000000e-01 : f32
    %41 = vector.broadcast %cst_22 : f32 to vector<4x8x128xf32>
    %42 = arith.addf %40, %41 : vector<4x8x128xf32>
    %43 = vector.extract_strided_slice %37 {offsets = [0, 8, 0], sizes = [4, 8, 128], strides = [1, 1, 1]} : vector<4x32x128xf32> to vector<4x8x128xf32>
    %cst_23 = arith.constant 5.000000e-01 : f32
    %44 = vector.broadcast %cst_23 : f32 to vector<4x8x128xf32>
    %45 = arith.mulf %44, %43 : vector<4x8x128xf32>
    %cst_24 = arith.constant 5.000000e-01 : f32
    %46 = vector.broadcast %cst_24 : f32 to vector<4x8x128xf32>
    %47 = arith.addf %45, %46 : vector<4x8x128xf32>
    %48 = vector.extract_strided_slice %37 {offsets = [0, 16, 0], sizes = [4, 8, 128], strides = [1, 1, 1]} : vector<4x32x128xf32> to vector<4x8x128xf32>
    %49 = vector.extract_strided_slice %37 {offsets = [0, 24, 0], sizes = [4, 8, 128], strides = [1, 1, 1]} : vector<4x32x128xf32> to vector<4x8x128xf32>
    %cst_25 = arith.constant 5.000000e-01 : f32
    %50 = vector.broadcast %cst_25 : f32 to vector<4x8x128xf32>
    %51 = arith.mulf %50, %49 : vector<4x8x128xf32>
    %cst_26 = arith.constant 5.000000e-01 : f32
    %52 = vector.broadcast %cst_26 : f32 to vector<4x8x128xf32>
    %53 = arith.addf %51, %52 : vector<4x8x128xf32>
    %54 = arith.mulf %47, %4 : vector<4x8x128xf32>
    %55 = arith.mulf %42, %48 : vector<4x8x128xf32>
    %56 = arith.addf %54, %55 : vector<4x8x128xf32>
    %57 = math.tanh %56 : vector<4x8x128xf32>
    %58 = arith.mulf %53, %57 : vector<4x8x128xf32>
    %59 = vector.shape_cast %22 : vector<8x128xf32> to vector<1x8x128xf32>
    %60 = vector.broadcast %59 : vector<1x8x128xf32> to vector<4x8x128xf32>
    %61 = arith.mulf %58, %60 : vector<4x8x128xf32>
    %cst_27 = arith.constant dense<0.000000e+00> : vector<4x128xf32>
    %62 = vector.multi_reduction <add>, %61, %cst_27 [1] : vector<4x8x128xf32> to vector<4x128xf32>
    %cst_28 = arith.constant 0.000000e+00 : f32
    %63 = vector.broadcast %cst_28 : f32 to vector<4x128xf32>
    %64 = arith.maximumf %62, %63 : vector<4x128xf32>
    %c0_29 = arith.constant 0 : index
    %c0_30 = arith.constant 0 : index
    %65 = vector.load %arg11[%c0_29, %c0_30] : memref<4x128xf32, #tpu.memory_space<vmem>>, vector<4x128xf32>
    tpu.vector_store %arg11[%c0_29, %c0_30], %64 {strides = array<i32>} : memref<4x128xf32, #tpu.memory_space<vmem>>, vector<4x128xf32>,
    %c0_31 = arith.constant 0 : index
    %c0_32 = arith.constant 0 : index
    %c0_33 = arith.constant 0 : index
    %66 = vector.load %arg10[%c0_31, %c0_32, %c0_33] : memref<4x8x128xf32, #tpu.memory_space<vmem>>, vector<4x8x128xf32>
    tpu.vector_store %arg10[%c0_31, %c0_32, %c0_33], %56 {strides = array<i32>} : memref<4x8x128xf32, #tpu.memory_space<vmem>>, vector<4x8x128xf32>,
    %c0_34 = arith.constant 0 : index
    %c0_35 = arith.constant 0 : index
    %c0_36 = arith.constant 0 : index
    %67 = vector.load %arg9[%c0_34, %c0_35, %c0_36] : memref<1x4x128xf32, #tpu.memory_space<vmem>>, vector<1x4x128xf32>
    %68 = vector.shape_cast %67 : vector<1x4x128xf32> to vector<4x128xf32>
    %69 = vector.shape_cast %64 : vector<4x128xf32> to vector<1x4x128xf32>
    tpu.vector_store %arg9[%c0_34, %c0_35, %c0_36], %69 {strides = array<i32>} : memref<1x4x128xf32, #tpu.memory_space<vmem>>, vector<1x4x128xf32>,
    return
  }
  func.func @transform_0(%arg0: i32, %arg1: i32) -> (i32, i32, i32) {
    %c0_i32 = arith.constant 0 : i32
    %c0_i32_0 = arith.constant 0 : i32
    return %arg1, %arg0, %c0_i32 : i32, i32, i32
  }
  func.func @transform_1(%arg0: i32, %arg1: i32) -> (i32, i32) {
    %c0_i32 = arith.constant 0 : i32
    %c0_i32_0 = arith.constant 0 : i32
    return %arg0, %c0_i32 : i32, i32
  }
  func.func @transform_2(%arg0: i32, %arg1: i32) -> (i32, i32, i32) {
    %c0_i32 = arith.constant 0 : i32
    %c0_i32_0 = arith.constant 0 : i32
    %c0_i32_1 = arith.constant 0 : i32
    return %arg0, %c0_i32, %c0_i32_0 : i32, i32, i32
  }
  func.func @transform_3(%arg0: i32, %arg1: i32) -> (i32, i32) {
    %c0_i32 = arith.constant 0 : i32
    %c0_i32_0 = arith.constant 0 : i32
    %c0_i32_1 = arith.constant 0 : i32
    return %c0_i32, %c0_i32_0 : i32, i32
  }
  func.func @transform_4(%arg0: i32, %arg1: i32) -> (i32, i32) {
    %c0_i32 = arith.constant 0 : i32
    %c0_i32_0 = arith.constant 0 : i32
    %c0_i32_1 = arith.constant 0 : i32
    return %c0_i32, %c0_i32_0 : i32, i32
  }
  func.func @transform_5(%arg0: i32, %arg1: i32) -> (i32, i32) {
    %c0_i32 = arith.constant 0 : i32
    %c0_i32_0 = arith.constant 0 : i32
    %c0_i32_1 = arith.constant 0 : i32
    return %c0_i32, %c0_i32_0 : i32, i32
  }
  func.func @transform_6(%arg0: i32, %arg1: i32) -> (i32, i32) {
    %c0_i32 = arith.constant 0 : i32
    %c0_i32_0 = arith.constant 0 : i32
    %c0_i32_1 = arith.constant 0 : i32
    return %c0_i32, %c0_i32_0 : i32, i32
  }
  func.func @transform_7(%arg0: i32, %arg1: i32) -> (i32, i32, i32) {
    %c0_i32 = arith.constant 0 : i32
    %c0_i32_0 = arith.constant 0 : i32
    return %arg1, %arg0, %c0_i32 : i32, i32, i32
  }
  func.func @transform_8(%arg0: i32, %arg1: i32) -> (i32, i32, i32) {
    %c0_i32 = arith.constant 0 : i32
    %c0_i32_0 = arith.constant 0 : i32
    %c0_i32_1 = arith.constant 0 : i32
    return %arg0, %c0_i32, %c0_i32_0 : i32, i32, i32
  }
}

</mosaic_0001>

<bundles_post_ra>
// kernel: lstmwebnet_forward_seq.1
= control target key start
LH: loop header
LB: loop body
LE: loop exit
PB: predicated region body
PF: predicated region fallthrough
CT: control target
= control target key end

     0   :  { %14 = vsyncpa [#allocation4], 0  ;;  %s1051_s0 = inlined_call_operand.hbm [shape: f32[1,4,8], index: 0, kind: input, shape index: {}]   ;;  %s1052_s1 = inlined_call_operand.hbm [shape: f32[4,128], index: 1, kind: input, shape index: {}]   ;;  %s1053_s2 = inlined_call_operand.hbm [shape: f32[4,8,128], index: 2, kind: input, shape index: {}]   ;;  %s1054_s3 = inlined_call_operand.vmem [shape: bf16[8,128], index: 3, kind: input, shape index: {}]   ;;  %s1055_s4 = inlined_call_operand.hbm [shape: bf16[128,128], index: 4, kind: input, shape index: {}]   ;;  %s1056_s5 = inlined_call_operand.vmem [shape: f32[1,128], index: 5, kind: input, shape index: {}]   ;;  %s1057_s6 = inlined_call_operand.hbm [shape: f32[104,128], index: 6, kind: input, shape index: {}]   ;;  %s1058_s7 = inlined_call_operand.hbm [shape: f32[1,4,128], index: 7, kind: output, shape index: {0}]   ;;  %s1059_s8 = inlined_call_operand.hbm [shape: f32[4,8,128], index: 8, kind: output, shape index: {1}]  }
   0x1   :  { %15 = vsyncpa [#allocation7], 0 }
   0x2   :  { %16 = vsyncpa [#allocation10], 0 }
   0x3   :  { %17 = vsyncpa [#allocation5], 0 }
   0x4   :  { %18 = vsyncpa [#allocation14], 0  ;;  %s861_s27 = smov [#allocation6]   ;;  %s862_s29 = smov [#allocation9]  }
   0x5   :  { %s35_s28 = sshll.u32 %s861_s27, 4  ;;  %s58_s30 = sshll.u32 %s862_s29, 4  ;;  %s36_s28 = int_to_ptr.vmem [resolvable:$true] %s35_s28  ;;  %s920_s30 = int_to_ptr.vmem [resolvable:$true] %s58_s30 }
   0x6   :  { %s697_s11 = scalar_lea.hbm %s1052_s1, 64 }
   0x7   :  { %p698_p0 = scmp.ne.s32.totalorder %s1052_s1, %s697_s11  ;;  %p701_p1 = scmp.lt.u32.totalorder %s697_s11, %s1052_s1 }
   0x9   :  { %p703_p2 = pnand %p701_p1, %p698_p0 }
   0xb   :  { %706 = shalt.err (!%p703_p2)
}
   0xc   :  { %s707_s16 = scalar_lea.vmem %s36_s28, 64  ;;  %p712_p4 = scmp.lt.s32.totalorder %s36_s28, %s36_s28 }
   0xd   :  { %p708_p3 = scmp.ne.s32.totalorder %s36_s28, %s707_s16  ;;  %p713_p5 = scmp.lt.s32.totalorder %s707_s16, %s707_s16 }
   0xf   :  { %p714_p6 = por %p713_p5, %p712_p4 }
  0x11   :  { %p715_p7 = pnand %p714_p6, %p708_p3 }
  0x13   :  { %718 = shalt.err (!%p715_p7)
}
  0x14   :  { %38 = dma.hbm_to_vmem [thread:$0]  %s1052_s1, 64, %s36_s28, [#allocation7]  }
  0x15   :  { %s719_s21 = scalar_lea.hbm %s1055_s4, 1024 }
  0x16   :  { %p720_p8 = scmp.ne.s32.totalorder %s1055_s4, %s719_s21  ;;  %p723_p9 = scmp.lt.u32.totalorder %s719_s21, %s1055_s4 }
  0x18   :  { %p725_p10 = pnand %p723_p9, %p720_p8 }
  0x1a   :  { %728 = shalt.err (!%p725_p10)
}
  0x1b   :  { %s729_s26 = scalar_lea.vmem %s920_s30, 1024  ;;  %p734_p12 = scmp.lt.s32.totalorder %s920_s30, %s920_s30 }
  0x1c   :  { %p730_p11 = scmp.ne.s32.totalorder %s920_s30, %s729_s26  ;;  %p735_p13 = scmp.lt.s32.totalorder %s729_s26, %s729_s26 }
  0x1e   :  { %p736_p0 = por %p735_p13, %p734_p12 }
  0x20   :  { %p737_p1 = pnand %p736_p0, %p730_p11 }
  0x22   :  { %740 = shalt.err (!%p737_p1)
}
  0x23   :  { %s863_s1 = smov 64   ;;  %s864_s27 = smov 4  }
  0x24   :  { %64 = dma.hbm_to_vmem [thread:$0]  %s1055_s4, 1024, %s920_s30, [#allocation10], %s863_s1, %s863_s1, %s864_s27  }
  0x25   :  { %s865_s9 = smov [#allocation3]   ;;  %s866_s11 = smov [#allocation8]  }
  0x26   :  { %s25_s10 = sshll.u32 %s865_s9, 4  ;;  %s44_s12 = sshll.u32 %s866_s11, 4  ;;  %s26_s10 = int_to_ptr.vmem [resolvable:$true] %s25_s10  ;;  %s951_s12 = int_to_ptr.vmem [resolvable:$true] %s44_s12 }
  0x27   :  { %s741_s15 = scalar_lea.hbm %s1051_s0, 64 }
  0x28   :  { %p742_p2 = scmp.ne.s32.totalorder %s1051_s0, %s741_s15  ;;  %p745_p3 = scmp.lt.u32.totalorder %s741_s15, %s1051_s0 }
  0x2a   :  { %p747_p4 = pnand %p745_p3, %p742_p2 }
  0x2c   :  { %750 = shalt.err (!%p747_p4)
}
  0x2d   :  { %s751_s4 = scalar_lea.vmem %s26_s10, 64  ;;  %p756_p6 = scmp.lt.s32.totalorder %s26_s10, %s26_s10 }
  0x2e   :  { %p752_p5 = scmp.ne.s32.totalorder %s26_s10, %s751_s4  ;;  %p757_p7 = scmp.lt.s32.totalorder %s751_s4, %s751_s4 }
  0x30   :  { %p758_p8 = por %p757_p7, %p756_p6 }
  0x32   :  { %p759_p9 = pnand %p758_p8, %p752_p5 }
  0x34   :  { %762 = shalt.err (!%p759_p9)
}
  0x35   :  { %28 = dma.hbm_to_vmem [thread:$0]  %s1051_s0, 64, %s26_s10, [#allocation4]  }
  0x36   :  { %s763_s23 = scalar_lea.hbm %s1053_s2, 512 }
  0x37   :  { %p764_p10 = scmp.ne.s32.totalorder %s1053_s2, %s763_s23  ;;  %p767_p11 = scmp.lt.u32.totalorder %s763_s23, %s1053_s2 }
  0x39   :  { %p769_p12 = pnand %p767_p11, %p764_p10 }
  0x3b   :  { %772 = shalt.err (!%p769_p12)
}
  0x3c   :  { %s773_s27 = scalar_lea.vmem %s951_s12, 512  ;;  %p778_p0 = scmp.lt.s32.totalorder %s951_s12, %s951_s12 }
  0x3d   :  { %p774_p13 = scmp.ne.s32.totalorder %s951_s12, %s773_s27  ;;  %p779_p1 = scmp.lt.s32.totalorder %s773_s27, %s773_s27 }
  0x3f   :  { %p780_p2 = por %p779_p1, %p778_p0 }
  0x41   :  { %p781_p3 = pnand %p780_p2, %p774_p13 }
  0x43   :  { %784 = shalt.err (!%p781_p3)
}
  0x44   :  { %s867_s0 = smov 128   ;;  %s868_s28 = smov 8  }
  0x45   :  { %50 = dma.hbm_to_vmem [thread:$0]  %s1053_s2, 512, %s951_s12, [#allocation7], %s867_s0, %s867_s0, %s868_s28  }
  0x46   :  { %s869_s10 = smov [#allocation11]   ;;  %s785_s15 = scalar_lea.hbm %s1057_s6, 1664 }
  0x47   :  { %s72_s11 = sshll.u32 %s869_s10, 4  ;;  %p786_p4 = scmp.ne.s32.totalorder %s1057_s6, %s785_s15  ;;  %s73_s11 = int_to_ptr.vmem [resolvable:$true] %s72_s11 }
  0x48   :  { %p789_p5 = scmp.lt.u32.totalorder %s785_s15, %s1057_s6 }
  0x4a   :  { %p791_p6 = pnand %p789_p5, %p786_p4 }
  0x4c   :  { %794 = shalt.err (!%p791_p6)
}
  0x4d   :  { %s795_s4 = scalar_lea.vmem %s73_s11, 1664  ;;  %p800_p8 = scmp.lt.s32.totalorder %s73_s11, %s73_s11 }
  0x4e   :  { %p796_p7 = scmp.ne.s32.totalorder %s73_s11, %s795_s4  ;;  %p801_p9 = scmp.lt.s32.totalorder %s795_s4, %s795_s4 }
  0x50   :  { %p802_p10 = por %p801_p9, %p800_p8 }
  0x52   :  { %p803_p11 = pnand %p802_p10, %p796_p7 }
  0x54   :  { %806 = shalt.err (!%p803_p11)
}
  0x55   :  { %78 = dma.hbm_to_vmem [thread:$0]  %s1057_s6, 1664, %s73_s11, [#allocation10], %s867_s0, %s867_s0, %s868_s28  }
  0x56   :  { %851 = dma.done.wait [#allocation4], 64  }
  0x57   :  { %852 = vsyncadd [#allocation4], 4294967232 }
  0x58   :  { %853 = dma.done.wait [#allocation7], 576  }
  0x59   :  { %854 = vsyncadd [#allocation7], 4294966720 }
  0x5a   :  { %855 = dma.done.wait [#allocation10], 2688  }
  0x5b   :  { %856 = vsyncadd [#allocation10], 4294964608  ;;  %v870_v0 = vmov 0.0   ;;  %vm871_vm0 = vmmov 0   ;;  %v649_v1 = vld [vmem:[#allocation9] sm:$0xff]   ;;  %v650_v2 = vld [vmem:[#allocation9 + $0x8] sm:$0xff]   ;;  %v296_v22 = vlaneseq }
  0x5c   :  { %609 = vmatprep.subr.bf16.mxu0 %v870_v0  ;;  %629 = vmatprep.subr.bf16.mxu1 %v870_v0  ;;  %vm226_vm1 = vcmask 1043456   ;;  %v651_v3 = vld [vmem:[#allocation9 + $0x10] sm:$0xff]   ;;  %v114_v6 = vld [vmem:[#allocation3] sm:$0xf]  ;;  %v99_v7 = vld [vmem:[#allocation6] sm:$0xf] }
  0x5d   :  { %631 = vmatprep.mubr.msk.bf16.mxu1 %vm871_vm0, %v870_v0  ;;  %625 = vmatprep.mubr.msk.bf16.mxu0 %vm871_vm0, %v870_v0  ;;  %v116_v4 = vld [vmem:[%s1054_s3] sm:$0xf]  ;;  %v115_v8 = vpack.c.bf16 %v114_v6, %v114_v6  ;;  %vm222_vm2 = vcmask 64512   ;;  %100 = vst [vmem:[#allocation2] sm:$0xf] %v99_v7  ;;  %v652_v9 = vld [vmem:[#allocation9 + $0x18] sm:$0xff]  }
  0x5e   :  { %610 = vmatpush3.bf16.msra.mxu0 %v649_v1  ;;  %v228_v5 = vsel %vm226_vm1, %v116_v4, 0  ;;  %v653_v10 = vld [vmem:[#allocation9 + $0x20] sm:$0xff]   ;;  %v654_v11 = vld [vmem:[#allocation9 + $0x28] sm:$0xff]   ;;  %v655_v12 = vld [vmem:[#allocation9 + $0x30] sm:$0xff]   ;;  %v872_v20 = vmov 1966171168  }
  0x5f   :  { %611 = vmatprep.subr.bf16.mxu0 %v870_v0  ;;  %630 = vmatpush3.bf16.msra.mxu1 %v228_v5  ;;  %v656_v13 = vld [vmem:[#allocation9 + $0x38] sm:$0xff]   ;;  %v294_v21 = vunpack.c.l.s4 %v872_v20  ;;  %v297_v24 = vshrl.u32 %v296_v22, 7  ;;  %v597_v27 = vld [vmem:[%s1056_s5] ss:$0 sm:$0xff]  ;;  %v283_v43 = vld [vmem:[#allocation11 + $0x20] sm:$0xff]  ;;  %s873_s5 = smov [#allocation13]  }
  0x60   :  { %v279_v44 = vld [vmem:[#allocation11] sm:$0xff]  ;;  %v284_v47 = vld [vmem:[#allocation11 + $0x28] sm:$0xff]  ;;  %v285_v51 = vld [vmem:[#allocation11 + $0x30] sm:$0xff]  ;;  %s570_s21 = sshll.u32 %s873_s5, 4  ;;  %s571_s21 = int_to_ptr.vmem [resolvable:$true] %s570_s21 }
  0x61   :  { %v295_v23 = vunpack.c.0.s8 %v294_v21  ;;  %v319_v36 = vsub.s32 0, %v297_v24  ;;  %v280_v48 = vld [vmem:[#allocation11 + $0x8] sm:$0xff]  ;;  %v281_v53 = vld [vmem:[#allocation11 + $0x10] sm:$0xff]  ;;  %v1006_v60 = vld [vmem:[#allocation11 + $0x38] sm:$0xff]  ;;  %s807_s22 = scalar_lea.vmem %s571_s21, 512  ;;  %p812_p13 = scmp.lt.s32.totalorder %s571_s21, %s571_s21 }
  0x62   :  { %612 = vmatpush3.bf16.msra.mxu0 %v650_v2  ;;  %632 = vmatmul.mubr.msk.bf16.vlgmr.msra.gmra.mrb[0].mxu1 %vm222_vm2, %v115_v8  ;;  %v1008_v63 = vld [vmem:[#allocation11 + $0x18] sm:$0xff]  ;;  %v287_v7 = vld [vmem:[#allocation11 + $0x40] sm:$0xff]  ;;  %p808_p12 = scmp.ne.s32.totalorder %s571_s21, %s807_s22  ;;  %p813_p0 = scmp.lt.s32.totalorder %s807_s22, %s807_s22 }
  0x63   :  { %613 = vmatprep.subr.bf16.mxu0 %v870_v0  ;;  %v298_v25 = vsub.s32 %v295_v23, %v297_v24 }
  0x64   :  { %v109_v14 = vld [vmem:[#allocation2] sm:$0xf]  ;;  %p814_p1 = por %p813_p0, %p812_p13 }
  0x65   :  { %v117_v15 = vpack.c.bf16 %v109_v14, %v109_v14  ;;  %v360_v28 = vrot.slane %v109_v14, %v298_v25 }
  0x66   :  { %614 = vmatpush3.bf16.msra.mxu0 %v651_v3  ;;  %p815_p2 = pnand %p814_p1, %p808_p12 }
  0x67   :  { %615 = vmatprep.subr.bf16.mxu0 %v870_v0  ;;  %v361_v34 = vcombine.high %v360_v28, %v360_v28  ;;  %v368_v37 = vrot.slane %v360_v28, %v298_v25 }
  0x69   :  { %v375_v39 = vrot.slane %v361_v34, %v298_v25  ;;  %v381_v42 = vrot.slane %v368_v37, %v319_v36  ;;  %v376_v49 = vcombine.high %v368_v37, %v368_v37 }
  0x6a   :  { %616 = vmatpush3.bf16.msra.mxu0 %v652_v9 }
  0x6b   :  { %617 = vmatprep.subr.bf16.mxu0 %v870_v0  ;;  %v385_v50 = vrot.slane %v375_v39, %v319_v36  ;;  %v398_v52 = vmul.f32 %v381_v42, %v283_v43  ;;  %v399_v57 = vmul.f32 %v381_v42, %v284_v47  ;;  %v377_v59 = vcombine.high %v375_v39, %v375_v39 }
  0x6c   :  { %v389_v61 = vrot.slane %v376_v49, %v319_v36  ;;  %v400_v62 = vmul.f32 %v381_v42, %v285_v51 }
  0x6d   :  { %v402_v2 = vmul.f32 %v385_v50, %v283_v43  ;;  %v403_v6 = vmul.f32 %v385_v50, %v284_v47  ;;  %v404_v14 = vmul.f32 %v385_v50, %v285_v51 }
  0x6e   :  { %618 = vmatpush3.bf16.msra.mxu0 %v653_v10  ;;  %v393_v10 = vrot.slane %v377_v59, %v319_v36  ;;  %v407_v23 = vmul.f32 %v389_v61, %v284_v47 }
  0x6f   :  { %619 = vmatprep.subr.bf16.mxu0 %v870_v0 }
  0x70   :  { %v410_v28 = vmul.f32 %v393_v10, %v283_v43 }
  0x72   :  { %620 = vmatpush3.bf16.msra.mxu0 %v654_v11  ;;  %v401_v11 = vmul.f32 %v381_v42, %v1006_v60  ;;  %v412_v42 = vmul.f32 %v393_v10, %v285_v51 }
  0x73   :  { %621 = vmatprep.subr.bf16.mxu0 %v870_v0 }
  0x76   :  { %622 = vmatpush3.bf16.msra.mxu0 %v655_v12  ;;  %v288_v12 = vld [vmem:[#allocation11 + $0x48] sm:$0xff] }
  0x77   :  { %623 = vmatprep.subr.bf16.mxu0 %v870_v0 }
  0x7a   :  { %624 = vmatpush3.bf16.msra.mxu0 %v656_v13 }
  0x7d   :  { %626 = vmatmul.mubr.bf16.vlgmr.msra.gmra.mrb[0].mxu0 %v117_v15 }
 0x135   :  { %v264_v16 = vpop.f32.mrb[0].mxu1 }
 0x136   :  { %v633_v17 = vpop.f32.mrb[1].mxu1 }
 0x137   :  { %v267_v18 = vpop.f32.mrb[2].mxu1 }
 0x138   :  { %v634_v19 = vpop.f32.mrb[3].mxu1  ;;  %v406_v18 = vmul.f32 %v389_v61, %v283_v43 }
 0x139   :  { %v289_v19 = vld [vmem:[#allocation11 + $0x50] sm:$0xff] }
 0x150   :  { %v216_v26 = vpop.f32.mrb[0].mxu0 }
 0x151   :  { %v265_v29 = vadd.f32 %v264_v16, %v216_v26  ;;  %v627_v30 = vpop.f32.mrb[1].mxu0 }
 0x152   :  { %v219_v31 = vpop.f32.mrb[2].mxu0 }
 0x153   :  { %v277_v32 = vadd.f32 %v597_v27, %v265_v29  ;;  %v628_v33 = vpop.f32.mrb[3].mxu0  ;;  %v408_v27 = vmul.f32 %v389_v61, %v285_v51  ;;  %v411_v31 = vmul.f32 %v393_v10, %v284_v47 }
 0x155   :  { %v278_v35 = vmax.f32 %v277_v32, 0.0  ;;  %v1012_v32 = vld [vmem:[#allocation11 + $0x58] sm:$0xff] }
 0x157   :  { %v299_v38 = vrot.slane %v278_v35, %v298_v25 }
 0x159   :  { %v300_v40 = vcombine.high %v299_v38, %v299_v38  ;;  %v307_v41 = vrot.slane %v299_v38, %v298_v25 }
 0x15b   :  { %v314_v45 = vrot.slane %v300_v40, %v298_v25  ;;  %v320_v46 = vrot.slane %v307_v41, %v319_v36  ;;  %v315_v54 = vcombine.high %v307_v41, %v307_v41  ;;  %v405_v41 = vmul.f32 %v385_v50, %v1006_v60 }
 0x15d   :  { %v324_v55 = vrot.slane %v314_v45, %v319_v36  ;;  %v337_v56 = vmul.f32 %v320_v46, %v279_v44  ;;  %v338_v58 = vmul.f32 %v320_v46, %v280_v48  ;;  %v316_v0 = vcombine.high %v314_v45, %v314_v45 }
 0x15e   :  { %v339_v1 = vmul.f32 %v320_v46, %v281_v53  ;;  %v328_v3 = vrot.slane %v315_v54, %v319_v36  ;;  %v340_v13 = vmul.f32 %v320_v46, %v1008_v63 }
 0x15f   :  { %v341_v4 = vmul.f32 %v324_v55, %v279_v44  ;;  %v414_v5 = vadd.f32 %v398_v52, %v337_v56  ;;  %v342_v8 = vmul.f32 %v324_v55, %v280_v48  ;;  %v415_v9 = vadd.f32 %v399_v57, %v338_v58 }
 0x160   :  { %v332_v15 = vrot.slane %v316_v0, %v319_v36  ;;  %v343_v16 = vmul.f32 %v324_v55, %v281_v53  ;;  %v416_v17 = vadd.f32 %v400_v62, %v339_v1  ;;  %v345_v20 = vmul.f32 %v328_v3, %v279_v44 }
 0x161   :  { %v418_v21 = vadd.f32 %v402_v2, %v341_v4  ;;  %v430_v22 = vadd.f32 %v414_v5, %v287_v7  ;;  %v346_v24 = vmul.f32 %v328_v3, %v280_v48  ;;  %v419_v25 = vadd.f32 %v403_v6, %v342_v8 }
 0x162   :  { %v431_v26 = vadd.f32 %v415_v9, %v288_v12  ;;  %v347_v29 = vmul.f32 %v328_v3, %v281_v53  ;;  %v417_v30 = vadd.f32 %v401_v11, %v340_v13  ;;  %v349_v33 = vmul.f32 %v332_v15, %v279_v44 }
 0x163   :  { %v420_v34 = vadd.f32 %v404_v14, %v343_v16  ;;  %v432_v35 = vadd.f32 %v416_v17, %v289_v19  ;;  %v350_v36 = vmul.f32 %v332_v15, %v280_v48  ;;  %v422_v37 = vadd.f32 %v406_v18, %v345_v20  ;;  %v102_v18 = vld [vmem:[#allocation8 + $0x8] sm:$0xff] }
 0x164   :  { %v434_v38 = vadd.f32 %v418_v21, %v287_v7  ;;  %657 = vtanh.f32 %v430_v22  ;;  %v423_v39 = vadd.f32 %v407_v23, %v346_v24  ;;  %v435_v40 = vadd.f32 %v419_v25, %v288_v12 }
 0x165   :  { %659 = vtanh.f32 %v431_v26  ;;  %v424_v45 = vadd.f32 %v408_v27, %v347_v29  ;;  %v433_v43 = vadd.f32 %v417_v30, %v1012_v32  ;;  %v351_v46 = vmul.f32 %v332_v15, %v281_v53 }
 0x166   :  { %v426_v47 = vadd.f32 %v410_v28, %v349_v33  ;;  %v436_v49 = vadd.f32 %v420_v34, %v289_v19  ;;  %661 = vtanh.f32 %v432_v35  ;;  %v344_v44 = vmul.f32 %v324_v55, %v1008_v63 }
 0x167   :  { %v427_v52 = vadd.f32 %v411_v31, %v350_v36  ;;  %v438_v48 = vadd.f32 %v422_v37, %v287_v7  ;;  %663 = vtanh.f32 %v434_v38  ;;  %v439_v54 = vadd.f32 %v423_v39, %v288_v12  ;;  %v103_v31 = vld [vmem:[#allocation8 + $0x10] sm:$0xff] }
 0x168   :  { %665 = vtanh.f32 %v435_v40  ;;  %v409_v56 = vmul.f32 %v389_v61, %v1006_v60  ;;  %v440_v57 = vadd.f32 %v424_v45, %v289_v19  ;;  %v348_v50 = vmul.f32 %v328_v3, %v1008_v63 }
 0x169   :  { %667 = vtanh.f32 %v433_v43  ;;  %v428_v51 = vadd.f32 %v412_v42, %v351_v46  ;;  %v442_v58 = vadd.f32 %v426_v47, %v287_v7  ;;  %v421_v53 = vadd.f32 %v405_v41, %v344_v44  ;;  %v101_v7 = vld [vmem:[#allocation8] sm:$0xff] }
 0x16a   :  { %669 = vtanh.f32 %v436_v49  ;;  %v443_v59 = vadd.f32 %v427_v52, %v288_v12  ;;  %v413_v55 = vmul.f32 %v393_v10, %v1006_v60  ;;  %v352_v0 = vmul.f32 %v332_v15, %v1008_v63 }
 0x16b   :  { %671 = vtanh.f32 %v438_v48  ;;  %v425_v2 = vadd.f32 %v409_v56, %v348_v50  ;;  %v444_v61 = vadd.f32 %v428_v51, %v289_v19  ;;  %v437_v3 = vadd.f32 %v421_v53, %v1012_v32  ;;  %v291_v50 = vld [vmem:[#allocation11 + $0x60] sm:$0xff] }
 0x16c   :  { %673 = vtanh.f32 %v439_v54  ;;  %v429_v11 = vadd.f32 %v413_v55, %v352_v0 }
 0x16d   :  { %675 = vtanh.f32 %v440_v57  ;;  %v441_v60 = vadd.f32 %v425_v2, %v1012_v32 }
 0x16e   :  { %v658_v62 = vpop.eup %657  ;;  %677 = vtanh.f32 %v442_v58  ;;  %v445_v26 = vadd.f32 %v429_v11, %v1012_v32  ;;  %v104_v32 = vld [vmem:[#allocation8 + $0x18] sm:$0xff] }
 0x16f   :  { %v660_v1 = vpop.eup %659  ;;  %v462_v4 = vmul.f32 0.5, %v658_v62  ;;  %679 = vtanh.f32 %v443_v59 }
 0x170   :  { %v470_v5 = vmul.f32 0.5, %v660_v1  ;;  %v662_v6 = vpop.eup %661  ;;  %681 = vtanh.f32 %v444_v61 }
 0x171   :  { %v466_v8 = vadd.f32 0.5, %v462_v4  ;;  %v664_v9 = vpop.eup %663  ;;  %683 = vtanh.f32 %v437_v3 }
 0x172   :  { %v474_v12 = vadd.f32 0.5, %v470_v5  ;;  %v666_v13 = vpop.eup %665  ;;  %v463_v63 = vmul.f32 0.5, %v664_v9  ;;  %685 = vtanh.f32 %v441_v60 }
 0x173   :  { %v490_v10 = vmul.f32 %v662_v6, %v466_v8  ;;  %v668_v14 = vpop.eup %667  ;;  %v471_v15 = vmul.f32 0.5, %v666_v13 }
 0x174   :  { %v486_v16 = vmul.f32 %v474_v12, %v101_v7  ;;  %v670_v17 = vpop.eup %669  ;;  %v467_v19 = vadd.f32 0.5, %v463_v63  ;;  %v478_v43 = vmul.f32 0.5, %v668_v14 }
 0x175   :  { %v672_v20 = vpop.eup %671  ;;  %v475_v21 = vadd.f32 0.5, %v471_v15 }
 0x176   :  { %v494_v22 = vadd.f32 %v490_v10, %v486_v16  ;;  %v674_v23 = vpop.eup %673  ;;  %v464_v24 = vmul.f32 0.5, %v672_v20  ;;  %v491_v25 = vmul.f32 %v670_v17, %v467_v19  ;;  %v482_v54 = vadd.f32 0.5, %v478_v43 }
 0x177   :  { %v676_v27 = vpop.eup %675  ;;  %v472_v28 = vmul.f32 0.5, %v674_v23  ;;  %v487_v29 = vmul.f32 %v475_v21, %v102_v18 }
 0x178   :  { %687 = vtanh.f32 %v494_v22  ;;  %550 = vst [vmem:[#allocation13] sm:$0xff] %v494_v22  ;;  %v678_v30 = vpop.eup %677  ;;  %v468_v33 = vadd.f32 0.5, %v464_v24 }
 0x179   :  { %v680_v34 = vpop.eup %679  ;;  %v465_v35 = vmul.f32 0.5, %v678_v30  ;;  %v476_v36 = vadd.f32 0.5, %v472_v28  ;;  %v495_v37 = vadd.f32 %v491_v25, %v487_v29  ;;  %689 = vtanh.f32 %v445_v26 }
 0x17a   :  { %v473_v38 = vmul.f32 0.5, %v680_v34  ;;  %v492_v39 = vmul.f32 %v676_v27, %v468_v33  ;;  %v682_v42 = vpop.eup %681 }
 0x17b   :  { %v469_v40 = vadd.f32 0.5, %v465_v35  ;;  %v488_v41 = vmul.f32 %v476_v36, %v103_v31  ;;  %551 = vst [vmem:[#allocation13 + $0x8] sm:$0xff] %v495_v37  ;;  %691 = vtanh.f32 %v495_v37  ;;  %v684_v46 = vpop.eup %683 }
 0x17c   :  { %v477_v45 = vadd.f32 0.5, %v473_v38  ;;  %v686_v52 = vpop.eup %685  ;;  %v479_v48 = vmul.f32 0.5, %v684_v46 }
 0x17d   :  { %v496_v47 = vadd.f32 %v492_v39, %v488_v41  ;;  %v493_v49 = vmul.f32 %v682_v42, %v469_v40 }
 0x17e   :  { %v489_v44 = vmul.f32 %v477_v45, %v104_v32 }
 0x17f   :  { %552 = vst [vmem:[#allocation13 + $0x10] sm:$0xff] %v496_v47  ;;  %693 = vtanh.f32 %v496_v47 }
 0x180   :  { %v497_v56 = vadd.f32 %v493_v49, %v489_v44 }
 0x182   :  { %v688_v57 = vpop.eup %687  ;;  %695 = vtanh.f32 %v497_v56  ;;  %553 = vst [vmem:[#allocation13 + $0x18] sm:$0xff] %v497_v56 }
 0x183   :  { %v502_v51 = vmul.f32 %v688_v57, %v482_v54 }
 0x184   :  { %818 = shalt.err (!%p815_p2)
}
 0x185   :  { %s819_s25 = scalar_lea.hbm %s1059_s8, 512 }
 0x186   :  { %p820_p3 = scmp.ne.s32.totalorder %s1059_s8, %s819_s25  ;;  %p823_p4 = scmp.lt.u32.totalorder %s819_s25, %s1059_s8 }
 0x188   :  { %p825_p5 = pnand %p823_p4, %p820_p3 }
 0x18a   :  { %828 = shalt.err (!%p825_p5)
}
 0x18b   :  { %576 = dma.vmem_to_hbm [thread:$0]  %s571_s21, 512, %s1059_s8, [#allocation14], %s867_s0, %s867_s0, %s868_s28   ;;  %v690_v58 = vpop.eup %689  ;;  %v480_v53 = vmul.f32 0.5, %v686_v52  ;;  %v483_v59 = vadd.f32 0.5, %v479_v48  ;;  %v506_v62 = vmul.f32 %v502_v51, %v291_v50  ;;  %vm542_vm3 = vcmask 1041409  }
 0x18c   :  { %v692_v55 = vpop.eup %691  ;;  %v481_v2 = vmul.f32 0.5, %v690_v58  ;;  %vm544_vm4 = vcmask 1042434   ;;  %s874_s8 = smov [#allocation12]   ;;  %vm546_vm5 = vcmask 1043459  }
 0x18d   :  { %v503_v0 = vmul.f32 %v692_v55, %v483_v59  ;;  %v510_v1 = vrot.slane %v506_v62, 4  ;;  %v484_v61 = vadd.f32 0.5, %v480_v53  ;;  %v694_v5 = vpop.eup %693  ;;  %s561_s0 = sshll.u32 %s874_s8, 4  ;;  %s562_s0 = int_to_ptr.vmem [resolvable:$true] %s561_s0 }
 0x18e   :  { %v485_v9 = vadd.f32 0.5, %v481_v2  ;;  %v696_v11 = vpop.eup %695  ;;  %s829_s28 = scalar_lea.vmem %s562_s0, 64  ;;  %p834_p7 = scmp.lt.s32.totalorder %s562_s0, %s562_s0 }
 0x18f   :  { %v507_v4 = vmul.f32 %v503_v0, %v291_v50  ;;  %v511_v3 = vadd.f32 %v510_v1, %v506_v62  ;;  %v504_v6 = vmul.f32 %v694_v5, %v484_v61  ;;  %p830_p6 = scmp.ne.s32.totalorder %s562_s0, %s829_s28  ;;  %p835_p8 = scmp.lt.s32.totalorder %s829_s28, %s829_s28 }
 0x190   :  { %v505_v63 = vmul.f32 %v696_v11, %v485_v9 }
 0x191   :  { %v512_v7 = vrot.slane %v511_v3, 2  ;;  %v516_v8 = vrot.slane %v507_v4, 4  ;;  %v508_v12 = vmul.f32 %v504_v6, %v291_v50  ;;  %p836_p9 = por %p835_p8, %p834_p7 }
 0x192   :  { %v509_v15 = vmul.f32 %v505_v63, %v291_v50 }
 0x193   :  { %v513_v13 = vadd.f32 %v512_v7, %v511_v3  ;;  %v517_v60 = vadd.f32 %v516_v8, %v507_v4  ;;  %v522_v14 = vrot.slane %v508_v12, 4  ;;  %p837_p10 = pnand %p836_p9, %p830_p6 }
 0x194   :  { %v528_v19 = vrot.slane %v509_v15, 4 }
 0x195   :  { %v518_v10 = vrot.slane %v517_v60, 2  ;;  %v514_v16 = vrot.slane %v513_v13, 1  ;;  %v523_v18 = vadd.f32 %v522_v14, %v508_v12 }
 0x196   :  { %v529_v23 = vadd.f32 %v528_v19, %v509_v15 }
 0x197   :  { %v519_v17 = vadd.f32 %v518_v10, %v517_v60  ;;  %v524_v21 = vrot.slane %v523_v18, 2  ;;  %v515_v22 = vadd.f32 %v514_v16, %v513_v13 }
 0x198   :  { %v530_v26 = vrot.slane %v529_v23, 2 }
 0x199   :  { %v520_v20 = vrot.slane %v519_v17, 1  ;;  %v525_v25 = vadd.f32 %v524_v21, %v523_v18  ;;  %v534_v30 = vmax.f32 %v515_v22, 0.0 }
 0x19a   :  { %v531_v29 = vadd.f32 %v530_v26, %v529_v23 }
 0x19b   :  { %v521_v24 = vadd.f32 %v520_v20, %v519_v17  ;;  %v526_v27 = vrot.slane %v525_v25, 1 }
 0x19c   :  { %v532_v33 = vrot.slane %v531_v29, 1 }
 0x19d   :  { %v535_v28 = vmax.f32 %v521_v24, 0.0  ;;  %v527_v31 = vadd.f32 %v526_v27, %v525_v25 }
 0x19e   :  { %v533_v36 = vadd.f32 %v532_v33, %v531_v29 }
 0x19f   :  { %v543_v34 = vsel %vm542_vm3, %v535_v28, %v534_v30  ;;  %v536_v35 = vmax.f32 %v527_v31, 0.0 }
 0x1a0   :  { %v537_v38 = vmax.f32 %v533_v36, 0.0 }
 0x1a1   :  { %v545_v37 = vsel %vm544_vm4, %v536_v35, %v543_v34 }
 0x1a2   :  { %v547_v39 = vsel %vm546_vm5, %v537_v38, %v545_v37 }
 0x1a3   :  { %549 = vst [vmem:[#allocation2] sm:$0xf] %v547_v39  ;;  %554 = vst [vmem:[#allocation12] sm:$0xf] %v547_v39 }
 0x1a4   :  { %840 = shalt.err (!%p837_p10)
}
 0x1a5   :  { %s841_s14 = scalar_lea.hbm %s1058_s7, 64 }
 0x1a6   :  { %p842_p11 = scmp.ne.s32.totalorder %s1058_s7, %s841_s14  ;;  %p845_p12 = scmp.lt.u32.totalorder %s841_s14, %s1058_s7 }
 0x1a8   :  { %p847_p13 = pnand %p845_p12, %p842_p11 }
 0x1aa   :  { %850 = shalt.err (!%p847_p13)
}
 0x1ab   :  { %564 = dma.vmem_to_hbm [thread:$0]  %s562_s0, 64, %s1058_s7, [#allocation5]  }
 0x1ac   :  { %857 = dma.done.wait [#allocation5], 64  }
 0x1ad   :  { %858 = vsyncadd [#allocation5], 4294967232 }
 0x1ae   :  { %859 = dma.done.wait [#allocation14], 512  }
 0x1af   :  { %860 = vsyncadd [#allocation14], 4294966784 }
 0x1b0   :  { %583 = vsyncpa [#allocation4], 1 }
 0x1b1   :  { %584 = vsyncpa [#allocation7], 1 }
 0x1b2   :  { %585 = vsyncpa [#allocation10], 1 }
 0x1b3   :  { %586 = vsyncpa [#allocation5], 1 }
 0x1b4   :  { %587 = vsyncpa [#allocation14], 1 }

</bundles_post_ra>
